<compile_context>
chip_gen: v5e
topology: v5e:2x2
jax: 0.10.0
libtpu: 0.0.40
codegen_flags: <defaults>
</compile_context>

<pallas_src>
import functools

import jax
import jax.numpy as jnp
import numpy as np
from jax.experimental import pallas as pl
from jax.experimental.pallas import tpu as pltpu


def _lipschitz_partial_kernel(x1_ref, x2_ref, y1_ref, y2_ref, out_ref,
                              *, k, n_valid, steps, tile_n):
    """One grid step: accumulate per-point relu terms into a lane-dense partial.

    Blocks (lane-dense layout):
      x1_ref, x2_ref : (Dx, tile_n)
      y1_ref, y2_ref : (Dy, tile_n)
      out_ref        : (1, tile_n)   resident partial-sum accumulator (per `c`)
    """
    c = pl.program_id(0)   # "parallel" axis (megacore split on v7x)
    i = pl.program_id(1)   # "arbitrary" reduction axis

    @pl.when(i == 0)
    def _():
        out_ref[...] = jnp.zeros_like(out_ref)

    dx = x1_ref[...] - x2_ref[...]            # (Dx, tile_n)
    dy = y1_ref[...] - y2_ref[...]            # (Dy, tile_n)

    # Row-wise L2 norms: short sublane reduce over D, results stay lane-dense.
    sq_x = jnp.sum(dx * dx, axis=0, keepdims=True)   # (1, tile_n)
    sq_y = jnp.sum(dy * dy, axis=0, keepdims=True)   # (1, tile_n)
    nx = jnp.sqrt(sq_x)
    ny = jnp.sqrt(sq_y)

    # relu(ny / (nx + 0.001) - k).
    # Exact divide keeps rtol<=1e-5 vs the reference; pl.reciprocal(approx=True)
    # would move this to the EUP but costs ~2^-12 rel. error and the kernel is
    # DMA-bound anyway.
    l = jnp.maximum(ny / (nx + jnp.float32(1e-3)) - jnp.float32(k),
                    jnp.float32(0.0))

    # Mask padded (ragged-tail) lanes so they contribute exactly 0.
    col = (jax.lax.broadcasted_iota(jnp.int32, (1, tile_n), 1)
           + (c * steps + i) * tile_n)
    l = jnp.where(col < n_valid, l, jnp.float32(0.0))

    # Pure VPU accumulate into the resident lane-dense output block.
    out_ref[...] = out_ref[...] + l


def _round_up(x, m):
    return ((x + m - 1) // m) * m


def lipschitz_loss(x1, x2, y1, y2, *, k, reduction=None,
                   tile_n=4096, num_partials=2):
    """Pallas implementation of LipschitzLoss.forward. Returns a scalar."""
    x1 = jnp.asarray(x1, jnp.float32)
    x2 = jnp.asarray(x2, jnp.float32)
    y1 = jnp.asarray(y1, jnp.float32)
    y2 = jnp.asarray(y2, jnp.float32)

    Dx = x1.shape[-1]
    Dy = y1.shape[-1]
    x1 = x1.reshape(-1, Dx)
    x2 = x2.reshape(-1, Dx)
    y1 = y1.reshape(-1, Dy)
    y2 = y2.reshape(-1, Dy)
    N = x1.shape[0]
    assert x2.shape[0] == N and y1.shape[0] == N and y2.shape[0] == N

    # mean for None/'mean', sum otherwise (matches the PyTorch module).
    scale = (1.0 / N) if (reduction is None or reduction == "mean") else 1.0

    # Lane-dense layout: points along the 128-wide lane axis.
    # (Layout plumbing only; callers that already hold (D, N) data skip it.)
    x1t, x2t = x1.T, x2.T          # (Dx, N)
    y1t, y2t = y1.T, y2.T          # (Dy, N)

    # Tile sizing: multiple of 128 lanes, no larger than the (padded) problem.
    tile_n = max(128, _round_up(min(int(tile_n), _round_up(N, 128)), 128))
    total_tiles = pl.cdiv(N, tile_n)
    num_partials = max(1, min(int(num_partials), total_tiles))
    steps = pl.cdiv(total_tiles, num_partials)
    n_pad = num_partials * steps * tile_n

    if n_pad != N:
        pad = n_pad - N
        x1t = jnp.pad(x1t, ((0, 0), (0, pad)))
        x2t = jnp.pad(x2t, ((0, 0), (0, pad)))
        y1t = jnp.pad(y1t, ((0, 0), (0, pad)))
        y2t = jnp.pad(y2t, ((0, 0), (0, pad)))

    # Padded VMEM footprint (f32, sublanes rounded to 8, double-buffered
    # inputs + double-buffered (1, tile_n) output block), with headroom.
    dx_p, dy_p = _round_up(Dx, 8), _round_up(Dy, 8)
    vmem_est = 4 * tile_n * (2 * (2 * dx_p + 2 * dy_p) + 2 * 8)
    vmem_limit = int(min(max(2 * vmem_est, 16 << 20), 32 << 20))  # v7x-safe cap

    kernel = functools.partial(_lipschitz_partial_kernel,
                               k=float(k), n_valid=int(N),
                               steps=int(steps), tile_n=int(tile_n))

    in_map = lambda c, i: (0, c * steps + i)

    partials = pl.pallas_call(
        kernel,
        out_shape=jax.ShapeDtypeStruct((1, num_partials * tile_n), jnp.float32),
        grid_spec=pltpu.PrefetchScalarGridSpec(
            num_scalar_prefetch=0,
            grid=(num_partials, steps),
            in_specs=[
                pl.BlockSpec((Dx, tile_n), in_map),
                pl.BlockSpec((Dx, tile_n), in_map),
                pl.BlockSpec((Dy, tile_n), in_map),
                pl.BlockSpec((Dy, tile_n), in_map),
            ],
            out_specs=pl.BlockSpec((1, tile_n), lambda c, i: (0, c)),
        ),
        compiler_params=pltpu.CompilerParams(
            dimension_semantics=("parallel", "arbitrary"),
            vmem_limit_bytes=vmem_limit,
        ),
    )(x1t, x2t, y1t, y2t)

    # Tiny final reduce (num_partials * tile_n floats) + reduction scale.
    return jnp.sum(partials) * jnp.float32(scale)


def _reference(x1, x2, y1, y2, k, reduction=None):
    """Pure-JAX reference identical to the PyTorch forward."""
    nx = jnp.linalg.norm(x1 - x2, axis=-1)
    ny = jnp.linalg.norm(y1 - y2, axis=-1)
    l = jax.nn.relu(ny / (nx + 0.001) - k)
    if reduction is None or reduction == "mean":
        return jnp.mean(l)
    return jnp.sum(l)


if __name__ == "__main__":
    key = jax.random.PRNGKey(0)
    k1, k2, k3, k4 = jax.random.split(key, 4)

    # Small shapes consistent with the module: N points, input dim Dx, output
    # dim Dy.  N is deliberately not a multiple of 128 to exercise masking.
    N, Dx, Dy = 300, 32, 4
    K_LIP = 1.0  # deterministic module parameter `k`

    x1 = jax.random.normal(k1, (N, Dx), dtype=jnp.float32)
    x2 = jax.random.normal(k2, (N, Dx), dtype=jnp.float32)
    y1 = jax.random.normal(k3, (N, Dy), dtype=jnp.float32)
    y2 = jax.random.normal(k4, (N, Dy), dtype=jnp.float32)

    ref_mean = _reference(x1, x2, y1, y2, K_LIP, reduction=None)
    ref_sum = _reference(x1, x2, y1, y2, K_LIP, reduction="sum")

    # Default config (single big tile for this small N).
    loss = jax.block_until_ready(
        lipschitz_loss(x1, x2, y1, y2, k=K_LIP, reduction=None))
    np.testing.assert_allclose(np.asarray(loss), np.asarray(ref_mean),
                               rtol=1e-5, atol=1e-6)

    # Multi-tile / multi-partial / masked-ragged-tail path.
    loss_multi = jax.block_until_ready(
        lipschitz_loss(x1, x2, y1, y2, k=K_LIP, reduction=None, tile_n=128))
    np.testing.assert_allclose(np.asarray(loss_multi), np.asarray(ref_mean),
                               rtol=1e-5, atol=1e-6)

    # Sum reduction.
    loss_sum = jax.block_until_ready(
        lipschitz_loss(x1, x2, y1, y2, k=K_LIP, reduction="sum", tile_n=128))
    np.testing.assert_allclose(np.asarray(loss_sum), np.asarray(ref_sum),
                               rtol=1e-5, atol=1e-5)

    print("KERNEL_OK")
</pallas_src>

<mosaic_0001>
module attributes {stable_mosaic.version = 11 : i64} {
  func.func @_lipschitz_partial_kernel(%arg0: i32, %arg1: i32, %arg2: memref<32x384xf32, #tpu.memory_space<vmem>>, %arg3: memref<32x384xf32, #tpu.memory_space<vmem>>, %arg4: memref<4x384xf32, #tpu.memory_space<vmem>>, %arg5: memref<4x384xf32, #tpu.memory_space<vmem>>, %arg6: memref<1x384xf32, #tpu.memory_space<vmem>>) attributes {dimension_semantics = [#tpu.dimension_semantics<parallel>, #tpu.dimension_semantics<arbitrary>], iteration_bounds = array<i64: 1, 1>, scalar_prefetch = 0 : i64, scratch_operands = 0 : i64, tpu.core_type = #tpu.core_type<tc>, window_params = [{transform_indices = @transform_0, window_bounds = array<i64: 32, 384>}, {transform_indices = @transform_1, window_bounds = array<i64: 32, 384>}, {transform_indices = @transform_2, window_bounds = array<i64: 4, 384>}, {transform_indices = @transform_3, window_bounds = array<i64: 4, 384>}, {transform_indices = @transform_4, window_bounds = array<i64: 1, 384>}]} {
    %c0_i32 = arith.constant 0 : i32
    %0 = arith.cmpi eq, %arg1, %c0_i32 : i32
    %1 = arith.extui %0 : i1 to i32
    %c0_i32_0 = arith.constant 0 : i32
    %2 = arith.cmpi ne, %1, %c0_i32_0 : i32
    scf.if %2 {
      %cst_17 = arith.constant 0.000000e+00 : f32
      %37 = vector.broadcast %cst_17 : f32 to vector<1x384xf32>
      %c0_18 = arith.constant 0 : index
      %c0_19 = arith.constant 0 : index
      %38 = vector.load %arg6[%c0_18, %c0_19] : memref<1x384xf32, #tpu.memory_space<vmem>>, vector<1x384xf32>
      tpu.vector_store %arg6[%c0_18, %c0_19], %37 {strides = array<i32>} : memref<1x384xf32, #tpu.memory_space<vmem>>, vector<1x384xf32>,
    } else {
    }
    %c0 = arith.constant 0 : index
    %c0_1 = arith.constant 0 : index
    %3 = vector.load %arg2[%c0, %c0_1] : memref<32x384xf32, #tpu.memory_space<vmem>>, vector<32x384xf32>
    %c0_2 = arith.constant 0 : index
    %c0_3 = arith.constant 0 : index
    %4 = vector.load %arg3[%c0_2, %c0_3] : memref<32x384xf32, #tpu.memory_space<vmem>>, vector<32x384xf32>
    %5 = arith.subf %3, %4 : vector<32x384xf32>
    %c0_4 = arith.constant 0 : index
    %c0_5 = arith.constant 0 : index
    %6 = vector.load %arg4[%c0_4, %c0_5] : memref<4x384xf32, #tpu.memory_space<vmem>>, vector<4x384xf32>
    %c0_6 = arith.constant 0 : index
    %c0_7 = arith.constant 0 : index
    %7 = vector.load %arg5[%c0_6, %c0_7] : memref<4x384xf32, #tpu.memory_space<vmem>>, vector<4x384xf32>
    %8 = arith.subf %6, %7 : vector<4x384xf32>
    %9 = arith.mulf %5, %5 : vector<32x384xf32>
    %cst = arith.constant dense<0.000000e+00> : vector<384xf32>
    %10 = vector.multi_reduction <add>, %9, %cst [0] : vector<32x384xf32> to vector<384xf32>
    %11 = vector.shape_cast %10 : vector<384xf32> to vector<1x384xf32>
    %12 = arith.mulf %8, %8 : vector<4x384xf32>
    %cst_8 = arith.constant dense<0.000000e+00> : vector<384xf32>
    %13 = vector.multi_reduction <add>, %12, %cst_8 [0] : vector<4x384xf32> to vector<384xf32>
    %14 = vector.shape_cast %13 : vector<384xf32> to vector<1x384xf32>
    %15 = math.sqrt %11 : vector<1x384xf32>
    %16 = math.sqrt %14 : vector<1x384xf32>
    %cst_9 = arith.constant 1.000000e-03 : f32
    %17 = vector.broadcast %cst_9 : f32 to vector<1x384xf32>
    %18 = arith.addf %15, %17 : vector<1x384xf32>
    %19 = arith.divf %16, %18 : vector<1x384xf32>
    %cst_10 = arith.constant 1.000000e+00 : f32
    %20 = vector.broadcast %cst_10 : f32 to vector<1x384xf32>
    %21 = arith.subf %19, %20 : vector<1x384xf32>
    %cst_11 = arith.constant 0.000000e+00 : f32
    %22 = vector.broadcast %cst_11 : f32 to vector<1x384xf32>
    %23 = arith.maximumf %21, %22 : vector<1x384xf32>
    %24 = tpu.iota {dimensions = array<i32: 1>} : vector<1x384xi32>
    %c1_i32 = arith.constant 1 : i32
    %25 = arith.muli %arg0, %c1_i32 : i32
    %26 = arith.addi %25, %arg1 : i32
    %c384_i32 = arith.constant 384 : i32
    %27 = arith.muli %26, %c384_i32 : i32
    %28 = vector.broadcast %27 : i32 to vector<1x384xi32>
    %29 = arith.addi %24, %28 : vector<1x384xi32>
    %c300_i32 = arith.constant 300 : i32
    %30 = vector.broadcast %c300_i32 : i32 to vector<1x384xi32>
    %31 = arith.cmpi slt, %29, %30 : vector<1x384xi32>
    %cst_12 = arith.constant 0.000000e+00 : f32
    %32 = vector.broadcast %cst_12 : f32 to vector<1x384xf32>
    %33 = arith.select %31, %23, %32 : vector<1x384xi1>, vector<1x384xf32>
    %c0_13 = arith.constant 0 : index
    %c0_14 = arith.constant 0 : index
    %34 = vector.load %arg6[%c0_13, %c0_14] : memref<1x384xf32, #tpu.memory_space<vmem>>, vector<1x384xf32>
    %35 = arith.addf %34, %33 : vector<1x384xf32>
    %c0_15 = arith.constant 0 : index
    %c0_16 = arith.constant 0 : index
    %36 = vector.load %arg6[%c0_15, %c0_16] : memref<1x384xf32, #tpu.memory_space<vmem>>, vector<1x384xf32>
    tpu.vector_store %arg6[%c0_15, %c0_16], %35 {strides = array<i32>} : memref<1x384xf32, #tpu.memory_space<vmem>>, vector<1x384xf32>,
    return
  }
  func.func @transform_0(%arg0: i32, %arg1: i32) -> (i32, i32) {
    %c1_i32 = arith.constant 1 : i32
    %0 = arith.muli %arg0, %c1_i32 : i32
    %1 = arith.addi %0, %arg1 : i32
    %c0_i32 = arith.constant 0 : i32
    %c0_i32_0 = arith.constant 0 : i32
    return %c0_i32, %1 : i32, i32
  }
  func.func @transform_1(%arg0: i32, %arg1: i32) -> (i32, i32) {
    %c1_i32 = arith.constant 1 : i32
    %0 = arith.muli %arg0, %c1_i32 : i32
    %1 = arith.addi %0, %arg1 : i32
    %c0_i32 = arith.constant 0 : i32
    %c0_i32_0 = arith.constant 0 : i32
    return %c0_i32, %1 : i32, i32
  }
  func.func @transform_2(%arg0: i32, %arg1: i32) -> (i32, i32) {
    %c1_i32 = arith.constant 1 : i32
    %0 = arith.muli %arg0, %c1_i32 : i32
    %1 = arith.addi %0, %arg1 : i32
    %c0_i32 = arith.constant 0 : i32
    %c0_i32_0 = arith.constant 0 : i32
    return %c0_i32, %1 : i32, i32
  }
  func.func @transform_3(%arg0: i32, %arg1: i32) -> (i32, i32) {
    %c1_i32 = arith.constant 1 : i32
    %0 = arith.muli %arg0, %c1_i32 : i32
    %1 = arith.addi %0, %arg1 : i32
    %c0_i32 = arith.constant 0 : i32
    %c0_i32_0 = arith.constant 0 : i32
    return %c0_i32, %1 : i32, i32
  }
  func.func @transform_4(%arg0: i32, %arg1: i32) -> (i32, i32) {
    %c0_i32 = arith.constant 0 : i32
    %c0_i32_0 = arith.constant 0 : i32
    return %c0_i32, %arg0 : i32, i32
  }
}

</mosaic_0001>

<bundles_post_ra>
// kernel: tpu_custom_call.1
= control target key start
LH: loop header
LB: loop body
LE: loop exit
PB: predicated region body
PF: predicated region fallthrough
CT: control target
= control target key end

     0   :  { %9 = vsyncpa [#allocation3], 0  ;;  %s669_s0 = inlined_call_operand.hbm [shape: f32[32,384], index: 0, kind: input, shape index: {}]   ;;  %s670_s1 = inlined_call_operand.hbm [shape: f32[32,384], index: 1, kind: input, shape index: {}]   ;;  %s671_s2 = inlined_call_operand.hbm [shape: f32[4,384], index: 2, kind: input, shape index: {}]   ;;  %s672_s3 = inlined_call_operand.hbm [shape: f32[4,384], index: 3, kind: input, shape index: {}]   ;;  %s673_s4 = inlined_call_operand.hbm [shape: f32[1,384], index: 4, kind: output, shape index: {}]  }
   0x1   :  { %10 = vsyncpa [#allocation6], 0 }
   0x2   :  { %11 = vsyncpa [#allocation9], 0 }
   0x3   :  { %12 = vsyncpa [#allocation4], 0  ;;  %s38_s17 = sshll.u32 %s670_s1, 4  ;;  %s561_s18 = smov [#allocation5]   ;;  %s39_s17 = int_to_ptr.hbm [resolvable:$true] %s38_s17 }
   0x4   :  { %s40_s19 = sshll.u32 %s561_s18, 4  ;;  %s21_s22 = sshll.u32 %s669_s0, 4  ;;  %s41_s19 = int_to_ptr.vmem [resolvable:$true] %s40_s19  ;;  %s22_s22 = int_to_ptr.hbm [resolvable:$true] %s21_s22 }
   0x5   :  { %s562_s23 = smov 384   ;;  %s563_s24 = smov 24  }
   0x6   :  { %46 = dma.hbm_to_vmem [thread:$0]  %s39_s17, 1536, %s41_s19, [#allocation6], %s562_s23, %s562_s23, %s563_s24  }
   0x7   :  { %s564_s25 = smov [#allocation2]   ;;  %s56_s29 = sshll.u32 %s671_s2, 4  ;;  %s57_s29 = int_to_ptr.hbm [resolvable:$true] %s56_s29 }
   0x8   :  { %s23_s26 = sshll.u32 %s564_s25, 4  ;;  %s71_s5 = sshll.u32 %s672_s3, 4  ;;  %s24_s26 = int_to_ptr.vmem [resolvable:$true] %s23_s26  ;;  %s72_s5 = int_to_ptr.hbm [resolvable:$true] %s71_s5 }
   0x9   :  { %29 = dma.hbm_to_vmem [thread:$0]  %s22_s22, 1536, %s24_s26, [#allocation3], %s562_s23, %s562_s23, %s563_s24  }
   0xa   :  { %s565_s6 = smov [#allocation7]   ;;  %s566_s0 = smov [#allocation8]  }
   0xb   :  { %s58_s7 = sshll.u32 %s565_s6, 4  ;;  %s73_s8 = sshll.u32 %s566_s0, 4  ;;  %s59_s7 = int_to_ptr.vmem [resolvable:$true] %s58_s7  ;;  %s74_s8 = int_to_ptr.vmem [resolvable:$true] %s73_s8 }
   0xc   :  { %61 = dma.hbm_to_vmem [thread:$0]  %s57_s29, 192, %s59_s7, [#allocation6]  }
   0xd   :  { %76 = dma.hbm_to_vmem [thread:$0]  %s72_s5, 192, %s74_s8, [#allocation9]  }
   0xe   :  { %553 = dma.done.wait [#allocation3], 1536  }
   0xf   :  { %554 = vsyncadd [#allocation3], 4294965760 }
  0x10   :  { %555 = dma.done.wait [#allocation6], 1728  }
  0x11   :  { %556 = vsyncadd [#allocation6], 4294965568 }
  0x12   :  { %557 = dma.done.wait [#allocation9], 192  }
  0x13   :  { %558 = vsyncadd [#allocation9], 4294967104  ;;  %v105_v0 = vlaneseq  ;;  %v567_v2 = vmov 0.0   ;;  %v146_v3 = vld [vmem:[#allocation7] sm:$0xff]  ;;  %v148_v4 = vld [vmem:[#allocation8] sm:$0xff]  ;;  %vm204_vm1 = vcmask 1043456  }
  0x14   :  { %v147_v5 = vld [vmem:[#allocation7 + $0x8] sm:$0xf]  ;;  %v150_v6 = vsub.f32 %v146_v3, %v148_v4  ;;  %v149_v7 = vld [vmem:[#allocation8 + $0x8] sm:$0xf]  ;;  %v118_v11 = vld [vmem:[#allocation2 + $0x40] sm:$0xff]  ;;  %s568_s2 = smov [#allocation10]  }
  0x15   :  { %vm607_vm0 = vcmp.lt.s32.totalorder %v105_v0, 384  ;;  %v112_v8 = vld [vmem:[#allocation2 + $0x10] sm:$0xff]  ;;  %v115_v9 = vld [vmem:[#allocation2 + $0x28] sm:$0xff]  ;;  %v151_v10 = vsub.f32 %v147_v5, %v149_v7  ;;  %v121_v12 = vld [vmem:[#allocation2 + $0x58] sm:$0xff]  ;;  %s390_s3 = sshll.u32 %s568_s2, 4  ;;  %s392_s11 = sshll.u32 %s673_s4, 4  ;;  %s391_s3 = int_to_ptr.vmem [resolvable:$true] %s390_s3  ;;  %s393_s11 = int_to_ptr.hbm [resolvable:$true] %s392_s11 }
  0x16   :  { %109 = vst.msk [vmem:[#allocation10] sm:$0x7] %vm607_vm0, %v567_v2  ;;  %v124_v13 = vld [vmem:[#allocation5 + $0x10] sm:$0xff]  ;;  %v191_v14 = vmul.f32 %v150_v6, %v150_v6  ;;  %v127_v15 = vld [vmem:[#allocation5 + $0x28] sm:$0xff]  ;;  %v130_v16 = vld [vmem:[#allocation5 + $0x40] sm:$0xff] }
  0x17   :  { %v133_v17 = vld [vmem:[#allocation5 + $0x58] sm:$0xff]  ;;  %v136_v18 = vsub.f32 %v112_v8, %v124_v13  ;;  %v192_v19 = vmul.f32 %v151_v10, %v151_v10  ;;  %v139_v20 = vsub.f32 %v115_v9, %v127_v15  ;;  %v142_v21 = vsub.f32 %v118_v11, %v130_v16  ;;  %v110_v23 = vld [vmem:[#allocation2] sm:$0xff]  ;;  %v111_v24 = vld [vmem:[#allocation2 + $0x8] sm:$0xff] }
  0x18   :  { %v145_v22 = vsub.f32 %v121_v12, %v133_v17  ;;  %v113_v25 = vld [vmem:[#allocation2 + $0x18] sm:$0xff]  ;;  %195 = vst [vmem:[#allocation1] ss:$2 sm:$0xff] %v191_v14  ;;  %v114_v27 = vld [vmem:[#allocation2 + $0x20] sm:$0xff]  ;;  %v116_v28 = vld [vmem:[#allocation2 + $0x30] sm:$0xff] }
  0x19   :  { %v154_v26 = vmul.f32 %v136_v18, %v136_v18  ;;  %v117_v29 = vld [vmem:[#allocation2 + $0x38] sm:$0xff]  ;;  %197 = vst [vmem:[#allocation1 + $0x10] ss:$2 sm:$0xff] %v192_v19  ;;  %v157_v30 = vmul.f32 %v139_v20, %v139_v20  ;;  %v160_v31 = vmul.f32 %v142_v21, %v142_v21  ;;  %v119_v32 = vld [vmem:[#allocation2 + $0x48] sm:$0xff]  ;;  %v120_v33 = vld [vmem:[#allocation2 + $0x50] sm:$0xff] }
  0x1a   :  { %v122_v34 = vld [vmem:[#allocation5] sm:$0xff]  ;;  %v163_v35 = vmul.f32 %v145_v22, %v145_v22  ;;  %v123_v36 = vld [vmem:[#allocation5 + $0x8] sm:$0xff]  ;;  %v125_v37 = vld [vmem:[#allocation5 + $0x18] sm:$0xff] }
  0x1b   :  { %v126_v38 = vld [vmem:[#allocation5 + $0x20] sm:$0xff]  ;;  %v134_v39 = vsub.f32 %v110_v23, %v122_v34  ;;  %v182_v40 = vadd.f32 %v157_v30, %v154_v26  ;;  %v128_v41 = vld [vmem:[#allocation5 + $0x30] sm:$0xff]  ;;  %v129_v42 = vld [vmem:[#allocation5 + $0x38] sm:$0xff]  ;;  %v135_v44 = vsub.f32 %v111_v24, %v123_v36  ;;  %v137_v45 = vsub.f32 %v113_v25, %v125_v37 }
  0x1c   :  { %v131_v43 = vld [vmem:[#allocation5 + $0x48] sm:$0xff]  ;;  %v138_v46 = vsub.f32 %v114_v27, %v126_v38  ;;  %v132_v47 = vld [vmem:[#allocation5 + $0x50] sm:$0xff]  ;;  %v140_v48 = vsub.f32 %v116_v28, %v128_v41  ;;  %v141_v49 = vsub.f32 %v117_v29, %v129_v42 }
  0x1d   :  { %v143_v50 = vsub.f32 %v119_v32, %v131_v43  ;;  %v152_v51 = vmul.f32 %v134_v39, %v134_v39  ;;  %v183_v52 = vadd.f32 %v182_v40, %v160_v31  ;;  %v144_v53 = vsub.f32 %v120_v33, %v132_v47 }
  0x1e   :  { %v153_v54 = vmul.f32 %v135_v44, %v135_v44  ;;  %v155_v55 = vmul.f32 %v137_v45, %v137_v45  ;;  %v156_v56 = vmul.f32 %v138_v46, %v138_v46  ;;  %v158_v57 = vmul.f32 %v140_v48, %v140_v48 }
  0x1f   :  { %v159_v58 = vmul.f32 %v141_v49, %v141_v49  ;;  %v198_v59 = vld.sshfl [vmem:[#allocation1] sm:$0xff pattern:$0x75316420]  ;;  %v199_v60 = vld.sshfl [vmem:[#allocation1 + $0x8] sm:$0xff pattern:$0x75316420]  ;;  %v184_v61 = vadd.f32 %v183_v52, %v163_v35  ;;  %v161_v62 = vmul.f32 %v143_v50, %v143_v50  ;;  %v162_v5 = vmul.f32 %v144_v53, %v144_v53 }
  0x20   :  { %v164_v63 = vadd.f32 %v155_v55, %v152_v51  ;;  %v205_v2 = vsel %vm204_vm1, %v198_v59, 0.0  ;;  %v212_v3 = vsel %vm204_vm1, %v199_v60, 0.0  ;;  %v200_v4 = vld.sshfl [vmem:[#allocation1 + $0x10] sm:$0xff pattern:$0x75316420]  ;;  %v173_v6 = vadd.f32 %v156_v56, %v153_v54 }
  0x21   :  { %v206_v7 = vrot.slane %v205_v2, 4  ;;  %v213_v8 = vrot.slane %v212_v3, 4  ;;  %v219_v9 = vsel %vm204_vm1, %v200_v4, 0.0  ;;  %v185_v10 = vrot.slane %v184_v61, 4 }
  0x22   :  { %v220_v11 = vrot.slane %v219_v9, 4  ;;  %v165_v12 = vadd.f32 %v164_v63, %v158_v57  ;;  %v174_v13 = vadd.f32 %v173_v6, %v159_v58 }
  0x23   :  { %v207_v14 = vadd.f32 %v206_v7, %v205_v2  ;;  %v214_v15 = vadd.f32 %v213_v8, %v212_v3  ;;  %v186_v16 = vadd.f32 %v185_v10, %v184_v61 }
  0x24   :  { %v221_v17 = vadd.f32 %v220_v11, %v219_v9  ;;  %v166_v18 = vadd.f32 %v165_v12, %v161_v62  ;;  %v175_v19 = vadd.f32 %v174_v13, %v162_v5 }
  0x25   :  { %v208_v20 = vrot.slane %v207_v14, 2  ;;  %v215_v21 = vrot.slane %v214_v15, 2  ;;  %v187_v22 = vrot.slane %v186_v16, 2 }
  0x26   :  { %v222_v23 = vrot.slane %v221_v17, 2  ;;  %v167_v24 = vrot.slane %v166_v18, 4  ;;  %v176_v25 = vrot.slane %v175_v19, 4 }
  0x27   :  { %v209_v26 = vadd.f32 %v208_v20, %v207_v14  ;;  %v216_v27 = vadd.f32 %v215_v21, %v214_v15  ;;  %v188_v28 = vadd.f32 %v187_v22, %v186_v16 }
  0x28   :  { %v223_v29 = vadd.f32 %v222_v23, %v221_v17  ;;  %v168_v30 = vadd.f32 %v167_v24, %v166_v18  ;;  %v177_v31 = vadd.f32 %v176_v25, %v175_v19 }
  0x29   :  { %v210_v32 = vrot.slane %v209_v26, 1  ;;  %v189_v33 = vrot.slane %v188_v28, 1  ;;  %v217_v34 = vrot.slane %v216_v27, 1 }
  0x2a   :  { %v224_v35 = vrot.slane %v223_v29, 1  ;;  %v169_v36 = vrot.slane %v168_v30, 2  ;;  %v178_v37 = vrot.slane %v177_v31, 2 }
  0x2b   :  { %v190_v38 = vadd.f32 %v189_v33, %v188_v28  ;;  %v618_v42 = vadd.f32 %v210_v32, %v209_v26  ;;  %v620_v43 = vadd.f32 %v217_v34, %v216_v27 }
  0x2c   :  { %v616_v39 = vadd.f32 %v224_v35, %v223_v29  ;;  %v170_v40 = vadd.f32 %v169_v36, %v168_v30  ;;  %v179_v41 = vadd.f32 %v178_v37, %v177_v31 }
  0x2d   :  { %415 = vrsqrt.f32 %v190_v38  ;;  %vm257_vm2 = vcmp.eq.f32.partialorder %v190_v38, inf  ;;  %v260_v4 = vand.u32 2147483648, %v190_v38  ;;  %vm259_vm3 = vcmp.eq.f32.partialorder %v190_v38, 0.0 }
  0x2e   :  { %417 = vrsqrt.f32 %v616_v39  ;;  %v171_v44 = vrot.slane %v170_v40, 1  ;;  %v180_v45 = vrot.slane %v179_v41, 1  ;;  %vm293_vm10 = vcmp.eq.f32.partialorder %v616_v39, inf }
  0x2f   :  { %419 = vrsqrt.f32 %v618_v42  ;;  %vm295_vm11 = vcmp.eq.f32.partialorder %v616_v39, 0.0 }
  0x30   :  { %v172_v46 = vadd.f32 %v171_v44, %v170_v40  ;;  %v181_v47 = vadd.f32 %v180_v45, %v179_v41  ;;  %421 = vrsqrt.f32 %v620_v43 }
  0x32   :  { %423 = vrsqrt.f32 %v172_v46  ;;  %vm233_vm4 = vcmp.eq.f32.partialorder %v172_v46, inf  ;;  %v236_v19 = vand.u32 2147483648, %v172_v46  ;;  %vm245_vm5 = vcmp.eq.f32.partialorder %v181_v47, inf }
  0x33   :  { %v416_v48 = vpop.eup %415  ;;  %425 = vrsqrt.f32 %v181_v47  ;;  %v248_v21 = vand.u32 2147483648, %v181_v47  ;;  %vm235_vm6 = vcmp.eq.f32.partialorder %v172_v46, 0.0  ;;  %vm247_vm7 = vcmp.eq.f32.partialorder %v181_v47, 0.0 }
  0x34   :  { %v418_v49 = vpop.eup %417  ;;  %v251_v50 = vmul.f32 %v416_v48, %v190_v38 }
  0x35   :  { %v420_v52 = vpop.eup %419  ;;  %v287_v53 = vmul.f32 %v418_v49, %v616_v39 }
  0x36   :  { %v252_v51 = vmul.f32 %v416_v48, %v251_v50  ;;  %v422_v54 = vpop.eup %421  ;;  %v263_v2 = vmul.f32 %v420_v52, %v618_v42 }
  0x37   :  { %v288_v60 = vmul.f32 %v418_v49, %v287_v53  ;;  %v275_v3 = vmul.f32 %v422_v54, %v620_v43 }
  0x38   :  { %v253_v55 = vmul.f32 0.5, %v252_v51  ;;  %v424_v56 = vpop.eup %423  ;;  %v264_v12 = vmul.f32 %v420_v52, %v263_v2  ;;  %v353_v51 = vand.u32 127, %v105_v0 }
  0x39   :  { %v426_v57 = vpop.eup %425  ;;  %v227_v59 = vmul.f32 %v424_v56, %v172_v46  ;;  %v289_v8 = vmul.f32 0.5, %v288_v60  ;;  %v276_v13 = vmul.f32 %v422_v54, %v275_v3 }
  0x3a   :  { %v254_v58 = vsub.f32 1.5, %v253_v55  ;;  %v239_v61 = vmul.f32 %v426_v57, %v181_v47  ;;  %v265_v22 = vmul.f32 0.5, %v264_v12 }
  0x3b   :  { %v228_v63 = vmul.f32 %v424_v56, %v227_v59  ;;  %v290_v18 = vsub.f32 1.5, %v289_v8  ;;  %v277_v23 = vmul.f32 0.5, %v276_v13 }
  0x3c   :  { %v255_v62 = vmul.f32 %v416_v48, %v254_v58  ;;  %v240_v5 = vmul.f32 %v426_v57, %v239_v61  ;;  %v266_v31 = vsub.f32 1.5, %v265_v22  ;;  %v296_v48 = vand.u32 2147483648, %v616_v39 }
  0x3d   :  { %v229_v7 = vmul.f32 0.5, %v228_v63  ;;  %v291_v26 = vmul.f32 %v418_v49, %v290_v18  ;;  %v278_v32 = vsub.f32 1.5, %v277_v23  ;;  %v284_v18 = vand.u32 2147483648, %v620_v43 }
  0x3e   :  { %v256_v6 = vmul.f32 %v255_v62, %v190_v38  ;;  %v241_v9 = vmul.f32 0.5, %v240_v5  ;;  %v267_v40 = vmul.f32 %v420_v52, %v266_v31 }
  0x3f   :  { %v230_v11 = vsub.f32 1.5, %v229_v7  ;;  %v292_v36 = vmul.f32 %v291_v26, %v616_v39  ;;  %v279_v41 = vmul.f32 %v422_v54, %v278_v32  ;;  %v355_v7 = vadd.s32 256, %v353_v51 }
  0x40   :  { %v258_v10 = vsel %vm257_vm2, %v190_v38, %v256_v6  ;;  %v242_v15 = vsub.f32 1.5, %v241_v9  ;;  %v268_v54 = vmul.f32 %v267_v40, %v618_v42 }
  0x41   :  { %v261_v14 = vsel %vm259_vm3, %v260_v4, %v258_v10  ;;  %v231_v17 = vmul.f32 %v424_v56, %v230_v11  ;;  %v280_v55 = vmul.f32 %v279_v41, %v620_v43  ;;  %vm269_vm3 = vcmp.eq.f32.partialorder %v618_v42, inf }
  0x42   :  { %v300_v16 = vadd.f32 0.001, %v261_v14  ;;  %v243_v20 = vmul.f32 %v426_v57, %v242_v15  ;;  %v270_v11 = vsel %vm269_vm3, %v618_v42, %v268_v54  ;;  %v272_v15 = vand.u32 2147483648, %v618_v42 }
  0x43   :  { %v232_v24 = vmul.f32 %v231_v17, %v172_v46 }
  0x44   :  { %427 = vrcp.f32 %v300_v16  ;;  %v244_v25 = vmul.f32 %v243_v20, %v181_v47  ;;  %v342_v38 = vand.u32 2147483648, %v300_v16  ;;  %vm336_vm8 = vweird.f32 %v300_v16 }
  0x45   :  { %v234_v27 = vsel %vm233_vm4, %v172_v46, %v232_v24  ;;  %v340_v45 = vand.u32 2147483647, %v300_v16  ;;  %v294_v46 = vsel %vm293_vm10, %v616_v39, %v292_v36  ;;  %vm281_vm4 = vcmp.eq.f32.partialorder %v620_v43, inf }
  0x46   :  { %v246_v28 = vsel %vm245_vm5, %v181_v47, %v244_v25  ;;  %v237_v29 = vsel %vm235_vm6, %v236_v19, %v234_v27  ;;  %v343_v50 = vor.u32 1.1754944e-38, %v342_v38  ;;  %v297_v57 = vsel %vm295_vm11, %v296_v48, %v294_v46 }
  0x47   :  { %v249_v30 = vsel %vm247_vm7, %v248_v21, %v246_v28  ;;  %v298_v33 = vadd.f32 0.001, %v237_v29  ;;  %vm341_vm13 = vcmp.eq.f32.partialorder %v340_v45, 8.507059e+37  ;;  %vm283_vm10 = vcmp.eq.f32.partialorder %v620_v43, 0.0 }
  0x48   :  { %v299_v34 = vadd.f32 0.001, %v249_v30  ;;  %vm364_vm11 = vcmp.lt.s32.totalorder %v355_v7, 300 }
  0x49   :  { %429 = vrcp.f32 %v298_v33  ;;  %vm306_vm14 = vweird.f32 %v298_v33  ;;  %v310_v59 = vand.u32 2147483647, %v298_v33  ;;  %v312_v60 = vand.u32 2147483648, %v298_v33 }
  0x4a   :  { %v428_v35 = vpop.eup %427  ;;  %431 = vrcp.f32 %v299_v34  ;;  %vm321_vm15 = vweird.f32 %v299_v34  ;;  %v327_v63 = vand.u32 2147483648, %v299_v34  ;;  %v325_v4 = vand.u32 2147483647, %v299_v34 }
  0x4b   :  { %v332_v37 = vmul.f32 %v428_v35, %v300_v16  ;;  %vm337_vm9 = vweird.f32 %v428_v35  ;;  %v313_v9 = vor.u32 1.1754944e-38, %v312_v60  ;;  %vm311_vm6 = vcmp.eq.f32.partialorder %v310_v59, 8.507059e+37 }
  0x4c   :  { %vm633_vm12 = vmor %vm336_vm8, %vm337_vm9  ;;  %v328_v14 = vor.u32 1.1754944e-38, %v327_v63  ;;  %v282_v16 = vsel %vm281_vm4, %v620_v43, %v280_v55  ;;  %vm326_vm8 = vcmp.eq.f32.partialorder %v325_v4, 8.507059e+37  ;;  %vm271_vm9 = vcmp.eq.f32.partialorder %v618_v42, 0.0 }
  0x4d   :  { %v333_v44 = vsub.f32 1.0, %v332_v37  ;;  %v273_v21 = vsel %vm271_vm9, %v272_v15, %v270_v11  ;;  %v285_v24 = vsel %vm283_vm10, %v284_v18, %v282_v16 }
  0x4f   :  { %v334_v47 = vmul.f32 %v428_v35, %v333_v44  ;;  %v430_v52 = vpop.eup %429 }
  0x50   :  { %v432_v56 = vpop.eup %431  ;;  %v302_v58 = vmul.f32 %v430_v52, %v298_v33  ;;  %vm307_vm1 = vweird.f32 %v430_v52  ;;  %v368_v33 = vld [vmem:[#allocation10] sm:$0x7] }
  0x51   :  { %v335_v53 = vadd.f32 %v428_v35, %v334_v47  ;;  %v317_v61 = vmul.f32 %v432_v56, %v299_v34  ;;  %vm322_vm2 = vweird.f32 %v432_v56  ;;  %vm645_vm5 = vmor %vm306_vm14, %vm307_vm1 }
  0x52   :  { %v303_v0 = vsub.f32 1.0, %v302_v58  ;;  %vm651_vm7 = vmor %vm321_vm15, %vm322_vm2 }
  0x53   :  { %v339_v39 = vsel %vm633_vm12, %v428_v35, %v335_v53  ;;  %v318_v3 = vsub.f32 1.0, %v317_v61  ;;  %vm374_vm12 = vcmask 1040384  }
  0x54   :  { %v344_v62 = vsel %vm341_vm13, %v343_v50, %v339_v39  ;;  %v304_v5 = vmul.f32 %v430_v52, %v303_v0  ;;  %vm376_vm13 = vcmask 1041408  }
  0x55   :  { %v345_v2 = vmul.f32 %v344_v62, %v297_v57  ;;  %v319_v10 = vmul.f32 %v432_v56, %v318_v3 }
  0x56   :  { %v305_v12 = vadd.f32 %v430_v52, %v304_v5 }
  0x57   :  { %v406_v6 = vadd.f32 -1.0, %v345_v2  ;;  %v320_v17 = vadd.f32 %v432_v56, %v319_v10 }
  0x58   :  { %v309_v19 = vsel %vm645_vm5, %v430_v52, %v305_v12 }
  0x59   :  { %v351_v20 = vmax.f32 %v406_v6, 0.0  ;;  %v314_v22 = vsel %vm311_vm6, %v313_v9, %v309_v19  ;;  %v324_v23 = vsel %vm651_vm7, %v432_v56, %v320_v17 }
  0x5a   :  { %v315_v25 = vmul.f32 %v314_v22, %v273_v21  ;;  %v329_v26 = vsel %vm326_vm8, %v328_v14, %v324_v23 }
  0x5b   :  { %v330_v27 = vmul.f32 %v329_v26, %v285_v24  ;;  %v367_v28 = vsel %vm364_vm11, %v351_v20, 0.0 }
  0x5c   :  { %v404_v42 = vadd.f32 -1.0, %v315_v25  ;;  %v373_v31 = vrot.slane %v367_v28, 6 }
  0x5d   :  { %v405_v29 = vadd.f32 -1.0, %v330_v27 }
  0x5e   :  { %v349_v43 = vmax.f32 %v404_v42, 0.0 }
  0x5f   :  { %v350_v30 = vmax.f32 %v405_v29, 0.0 }
  0x61   :  { %v372_v32 = vrot.slane %v350_v30, 7 }
  0x63   :  { %v375_v34 = vsel %vm374_vm12, %v349_v43, %v372_v32 }
  0x64   :  { %v377_v35 = vsel %vm376_vm13, %v375_v34, %v373_v31 }
  0x65   :  { %v379_v36 = vadd.f32 %v377_v35, %v368_v33 }
  0x67   :  { %384 = vst.msk [vmem:[#allocation10] sm:$0x7] %vm607_vm0, %v379_v36 }
  0x68   :  { %395 = dma.vmem_to_hbm [thread:$0]  %s391_s3, 48, %s393_s11, [#allocation4]  }
  0x69   :  { %559 = dma.done.wait [#allocation4], 48  }
  0x6a   :  { %560 = vsyncadd [#allocation4], 4294967248 }
  0x6b   :  { %400 = vsyncpa [#allocation3], 1 }
  0x6c   :  { %401 = vsyncpa [#allocation6], 1 }
  0x6d   :  { %402 = vsyncpa [#allocation9], 1 }
  0x6e   :  { %403 = vsyncpa [#allocation4], 1 }

</bundles_post_ra>
